<compile_context>
chip_gen: v6e
topology: v6e:2x2x1
jax: 0.10.0
libtpu: 0.0.40
codegen_flags: <defaults>
</compile_context>

<pallas_src>
import functools

import jax
import jax.numpy as jnp
from jax.experimental import pallas as pl
from jax.experimental.pallas import tpu as pltpu

HIDDEN = 256
OUT_PAD = 128      # lane-dense padded width of the Q head
TILE_B = 256       # max batch tile: multiple of 8 sublanes, cheap on VMEM


def _softq_kernel(x_ref, a_ref, w1x_ref, w1a_ref, b1_ref,
                  w2_ref, b2_ref, w3_ref, b3_ref, out_ref):
    """relu(relu(x@W1x + a@W1a + b1) @ W2 + b2) @ W3pad + b3pad  (one batch tile)."""
    # fc1: two bf16 MXU dots into one f32 accumulator (fused "concat").
    h1 = jnp.dot(x_ref[...], w1x_ref[...], preferred_element_type=jnp.float32)
    h1 = h1 + jnp.dot(a_ref[...], w1a_ref[...],
                      preferred_element_type=jnp.float32)
    h1 = jnp.maximum(h1 + b1_ref[...], 0.0)                 # f32 bias + ReLU

    # fc2
    h2 = jnp.dot(h1.astype(w2_ref.dtype), w2_ref[...],
                 preferred_element_type=jnp.float32)
    h2 = jnp.maximum(h2 + b2_ref[...], 0.0)

    # fc3 (padded to 128 output lanes -> unmasked, lane-dense store)
    q = jnp.dot(h2.astype(w3_ref.dtype), w3_ref[...],
                preferred_element_type=jnp.float32)
    out_ref[...] = (q + b3_ref[...]).astype(out_ref.dtype)


@functools.partial(jax.jit, static_argnames=("tile_b",))
def soft_q_forward(x, a, packed, tile_b=TILE_B):
    """Pallas-backed SoftQNetwork forward.

    Args:
      x: (B, n_observations) float32 states.
      a: (B, n_actions) float32 actions.
      packed: dict from pack_params() (bf16 weights, f32 biases, padded head).
    Returns:
      (B, 1) float32 Q-values.
    """
    B, n_obs = x.shape
    n_act = a.shape[1]
    H = packed["w2"].shape[0]
    P = packed["w3"].shape[1]

    # Adaptive batch tile: never pad a tiny batch up to a full 256-row tile,
    # but keep the sublane (8) alignment required by the (8, 128) tiling rule.
    tb = min(tile_b, max(8, ((B + 7) // 8) * 8))
    nb = pl.cdiv(B, tb)
    b_pad = nb * tb
    dt = packed["w1x"].dtype

    # Pad the batch up to a tile multiple and cast activations to the matmul
    # dtype (halves activation DMA bytes).  No feature-axis concat.
    xp = jnp.zeros((b_pad, n_obs), dt).at[:B].set(x.astype(dt))
    ap = jnp.zeros((b_pad, n_act), dt).at[:B].set(a.astype(dt))

    const = lambda shape: pl.BlockSpec(shape, lambda i: (0, 0))

    flops_per_row = 2 * (n_obs * H + n_act * H + H * H + H * P)
    out = pl.pallas_call(
        _softq_kernel,
        out_shape=jax.ShapeDtypeStruct((b_pad, P), jnp.float32),
        grid=(nb,),
        in_specs=[
            pl.BlockSpec((tb, n_obs), lambda i: (i, 0)),       # x tile
            pl.BlockSpec((tb, n_act), lambda i: (i, 0)),       # a tile
            const((n_obs, H)),                                 # W1x (resident)
            const((n_act, H)),                                 # W1a
            const((1, H)),                                     # b1 (f32)
            const((H, H)),                                     # W2
            const((1, H)),                                     # b2 (f32)
            const((H, P)),                                     # W3 padded
            const((1, P)),                                     # b3 padded (f32)
        ],
        out_specs=pl.BlockSpec((tb, P), lambda i: (i, 0)),
        compiler_params=pltpu.CompilerParams(
            dimension_semantics=("parallel",)),                # v7x megacore
        cost_estimate=pl.CostEstimate(
            flops=b_pad * flops_per_row,
            transcendentals=0,
            bytes_accessed=(xp.size + ap.size) * 2 + b_pad * P * 4
                           + 2 * (n_obs + n_act + H + P) * H),
    )(xp, ap, packed["w1x"], packed["w1a"], packed["b1"],
      packed["w2"], packed["b2"], packed["w3"], packed["b3"])

    return out[:B, :1]


def init_params(key, n_observations, n_actions, hidden=HIDDEN):
    """torch.nn.Linear-style init U[-1/sqrt(fan_in), 1/sqrt(fan_in)].

    Weights stored as (in_features, out_features) so the kernel computes
    x @ W + b (numerically identical to torch's x @ W_t.T + b).
    """
    d_in = n_observations + n_actions
    keys = jax.random.split(key, 6)

    def lin(kw, kb, fan_in, fan_out):
        bound = 1.0 / jnp.sqrt(jnp.float32(fan_in))
        w = jax.random.uniform(kw, (fan_in, fan_out), jnp.float32, -bound, bound)
        b = jax.random.uniform(kb, (1, fan_out), jnp.float32, -bound, bound)
        return w, b

    w1, b1 = lin(keys[0], keys[1], d_in, hidden)
    w2, b2 = lin(keys[2], keys[3], hidden, hidden)
    w3, b3 = lin(keys[4], keys[5], hidden, 1)
    return dict(w1=w1, b1=b1, w2=w2, b2=b2, w3=w3, b3=b3)


def pack_params(params, n_observations, out_pad=OUT_PAD,
                compute_dtype=jnp.bfloat16):
    """Kernel-friendly weight layout.

    Splits W1 so the state/action concat is fused into two MXU dots, pads the
    Q head to a lane-dense width, and casts matmul operands to bf16.  Biases
    stay f32 (bias/ReLU run in f32 inside the kernel).
    """
    w1 = params["w1"]
    h = params["w2"].shape[0]
    w3p = jnp.zeros((h, out_pad), compute_dtype).at[:, :1].set(
        params["w3"].astype(compute_dtype))
    b3p = jnp.zeros((1, out_pad), jnp.float32).at[:, :1].set(params["b3"])
    return dict(
        w1x=w1[:n_observations].astype(compute_dtype),
        w1a=w1[n_observations:].astype(compute_dtype),
        b1=params["b1"],
        w2=params["w2"].astype(compute_dtype),
        b2=params["b2"],
        w3=w3p,
        b3=b3p,
    )


def _reference_f32(x, a, p):
    """Exact f32 reference of the PyTorch module."""
    xa = jnp.concatenate([x, a], axis=1)
    h1 = jnp.maximum(xa @ p["w1"] + p["b1"], 0.0)
    h2 = jnp.maximum(h1 @ p["w2"] + p["b2"], 0.0)
    return h2 @ p["w3"] + p["b3"]


def _reference_bf16(x, a, p, n_obs):
    """Reference that mirrors the kernel's bf16-matmul / f32-accumulate math."""
    bf = jnp.bfloat16
    h1 = (jnp.dot(x.astype(bf), p["w1"][:n_obs].astype(bf),
                  preferred_element_type=jnp.float32)
          + jnp.dot(a.astype(bf), p["w1"][n_obs:].astype(bf),
                    preferred_element_type=jnp.float32))
    h1 = jnp.maximum(h1 + p["b1"], 0.0)
    h2 = jnp.dot(h1.astype(bf), p["w2"].astype(bf),
                 preferred_element_type=jnp.float32)
    h2 = jnp.maximum(h2 + p["b2"], 0.0)
    q = jnp.dot(h2.astype(bf), p["w3"].astype(bf),
                preferred_element_type=jnp.float32)
    return q + p["b3"]


if __name__ == "__main__":
    key = jax.random.PRNGKey(0)
    k_param, k_x, k_a = jax.random.split(key, 3)

    batch = 2
    n_observations = 16
    n_actions = 8

    params = init_params(k_param, n_observations, n_actions)
    packed = pack_params(params, n_observations)

    x = jax.random.normal(k_x, (batch, n_observations), jnp.float32)
    a = jax.random.normal(k_a, (batch, n_actions), jnp.float32)

    q = soft_q_forward(x, a, packed)
    q = jax.block_until_ready(q)
    assert q.shape == (batch, 1), q.shape

    # Tight check vs. a reference doing the same bf16/f32 arithmetic.
    q_bf16_ref = _reference_bf16(x, a, params, n_observations)
    assert jnp.allclose(q, q_bf16_ref, atol=2e-3, rtol=2e-3), (q, q_bf16_ref)

    # Loose check vs. the exact f32 PyTorch-equivalent forward.
    q_f32_ref = _reference_f32(x, a, params)
    assert jnp.allclose(q, q_f32_ref, atol=5e-2, rtol=5e-2), (q, q_f32_ref)

    # Exercise a multi-tile batch (grid > 1, non-multiple of the tile) too.
    k_x2, k_a2 = jax.random.split(k_x)
    xb = jax.random.normal(k_x2, (600, n_observations), jnp.float32)
    ab = jax.random.normal(k_a2, (600, n_actions), jnp.float32)
    qb = jax.block_until_ready(soft_q_forward(xb, ab, packed))
    qb_ref = _reference_bf16(xb, ab, params, n_observations)
    assert qb.shape == (600, 1)
    assert jnp.allclose(qb, qb_ref, atol=2e-3, rtol=2e-3)

    print("KERNEL_OK")
</pallas_src>

<mosaic_0001>
module attributes {stable_mosaic.version = 11 : i64} {
  func.func @_softq_kernel(%arg0: i32, %arg1: memref<8x16xbf16, #tpu.memory_space<vmem>>, %arg2: memref<8x8xbf16, #tpu.memory_space<vmem>>, %arg3: memref<16x256xbf16, #tpu.memory_space<vmem>>, %arg4: memref<8x256xbf16, #tpu.memory_space<vmem>>, %arg5: memref<1x256xf32, #tpu.memory_space<vmem>>, %arg6: memref<256x256xbf16, #tpu.memory_space<vmem>>, %arg7: memref<1x256xf32, #tpu.memory_space<vmem>>, %arg8: memref<256x128xbf16, #tpu.memory_space<vmem>>, %arg9: memref<1x128xf32, #tpu.memory_space<vmem>>, %arg10: memref<8x128xf32, #tpu.memory_space<vmem>>) attributes {dimension_semantics = [#tpu.dimension_semantics<parallel>], iteration_bounds = array<i64: 1>, scalar_prefetch = 0 : i64, scratch_operands = 0 : i64, tpu.core_type = #tpu.core_type<tc>, window_params = [{transform_indices = @transform_0, window_bounds = array<i64: 8, 16>}, {transform_indices = @transform_1, window_bounds = array<i64: 8, 8>}, {pipeline_mode = #tpu.pipeline_mode<synchronous>, transform_indices = @transform_2, window_bounds = array<i64: 16, 256>}, {pipeline_mode = #tpu.pipeline_mode<synchronous>, transform_indices = @transform_3, window_bounds = array<i64: 8, 256>}, {pipeline_mode = #tpu.pipeline_mode<synchronous>, transform_indices = @transform_4, window_bounds = array<i64: 1, 256>}, {pipeline_mode = #tpu.pipeline_mode<synchronous>, transform_indices = @transform_5, window_bounds = array<i64: 256, 256>}, {pipeline_mode = #tpu.pipeline_mode<synchronous>, transform_indices = @transform_6, window_bounds = array<i64: 1, 256>}, {pipeline_mode = #tpu.pipeline_mode<synchronous>, transform_indices = @transform_7, window_bounds = array<i64: 256, 128>}, {pipeline_mode = #tpu.pipeline_mode<synchronous>, transform_indices = @transform_8, window_bounds = array<i64: 1, 128>}, {transform_indices = @transform_9, window_bounds = array<i64: 8, 128>}]} {
    %c0 = arith.constant 0 : index
    %c0_0 = arith.constant 0 : index
    %0 = vector.load %arg1[%c0, %c0_0] : memref<8x16xbf16, #tpu.memory_space<vmem>>, vector<8x16xbf16>
    %c0_1 = arith.constant 0 : index
    %c0_2 = arith.constant 0 : index
    %1 = vector.load %arg3[%c0_1, %c0_2] : memref<16x256xbf16, #tpu.memory_space<vmem>>, vector<16x256xbf16>
    %cst = arith.constant dense<0.000000e+00> : vector<8x256xf32>
    %2 = tpu.matmul %0, %1, %cst {dimension_numbers = #tpu.dot_dimension_numbers<[1], [0], [0], [1], [0, 0, 1, 1], [], []>} : vector<8x16xbf16>, vector<16x256xbf16>, vector<8x256xf32> -> vector<8x256xf32>
    %c0_3 = arith.constant 0 : index
    %c0_4 = arith.constant 0 : index
    %3 = vector.load %arg2[%c0_3, %c0_4] : memref<8x8xbf16, #tpu.memory_space<vmem>>, vector<8x8xbf16>
    %c0_5 = arith.constant 0 : index
    %c0_6 = arith.constant 0 : index
    %4 = vector.load %arg4[%c0_5, %c0_6] : memref<8x256xbf16, #tpu.memory_space<vmem>>, vector<8x256xbf16>
    %cst_7 = arith.constant dense<0.000000e+00> : vector<8x256xf32>
    %5 = tpu.matmul %3, %4, %cst_7 {dimension_numbers = #tpu.dot_dimension_numbers<[1], [0], [0], [1], [0, 0, 1, 1], [], []>} : vector<8x8xbf16>, vector<8x256xbf16>, vector<8x256xf32> -> vector<8x256xf32>
    %6 = arith.addf %2, %5 : vector<8x256xf32>
    %c0_8 = arith.constant 0 : index
    %c0_9 = arith.constant 0 : index
    %7 = vector.load %arg5[%c0_8, %c0_9] : memref<1x256xf32, #tpu.memory_space<vmem>>, vector<1x256xf32>
    %8 = vector.broadcast %7 : vector<1x256xf32> to vector<8x256xf32>
    %9 = arith.addf %6, %8 : vector<8x256xf32>
    %cst_10 = arith.constant 0.000000e+00 : f32
    %10 = vector.broadcast %cst_10 : f32 to vector<8x256xf32>
    %11 = arith.maximumf %9, %10 : vector<8x256xf32>
    %12 = arith.truncf %11 : vector<8x256xf32> to vector<8x256xbf16>
    %c0_11 = arith.constant 0 : index
    %c0_12 = arith.constant 0 : index
    %13 = vector.load %arg6[%c0_11, %c0_12] : memref<256x256xbf16, #tpu.memory_space<vmem>>, vector<256x256xbf16>
    %cst_13 = arith.constant dense<0.000000e+00> : vector<8x256xf32>
    %14 = tpu.matmul %12, %13, %cst_13 {dimension_numbers = #tpu.dot_dimension_numbers<[1], [0], [0], [1], [0, 0, 1, 1], [], []>} : vector<8x256xbf16>, vector<256x256xbf16>, vector<8x256xf32> -> vector<8x256xf32>
    %c0_14 = arith.constant 0 : index
    %c0_15 = arith.constant 0 : index
    %15 = vector.load %arg7[%c0_14, %c0_15] : memref<1x256xf32, #tpu.memory_space<vmem>>, vector<1x256xf32>
    %16 = vector.broadcast %15 : vector<1x256xf32> to vector<8x256xf32>
    %17 = arith.addf %14, %16 : vector<8x256xf32>
    %cst_16 = arith.constant 0.000000e+00 : f32
    %18 = vector.broadcast %cst_16 : f32 to vector<8x256xf32>
    %19 = arith.maximumf %17, %18 : vector<8x256xf32>
    %20 = arith.truncf %19 : vector<8x256xf32> to vector<8x256xbf16>
    %c0_17 = arith.constant 0 : index
    %c0_18 = arith.constant 0 : index
    %21 = vector.load %arg8[%c0_17, %c0_18] : memref<256x128xbf16, #tpu.memory_space<vmem>>, vector<256x128xbf16>
    %cst_19 = arith.constant dense<0.000000e+00> : vector<8x128xf32>
    %22 = tpu.matmul %20, %21, %cst_19 {dimension_numbers = #tpu.dot_dimension_numbers<[1], [0], [0], [1], [0, 0, 1, 1], [], []>} : vector<8x256xbf16>, vector<256x128xbf16>, vector<8x128xf32> -> vector<8x128xf32>
    %c0_20 = arith.constant 0 : index
    %c0_21 = arith.constant 0 : index
    %23 = vector.load %arg9[%c0_20, %c0_21] : memref<1x128xf32, #tpu.memory_space<vmem>>, vector<1x128xf32>
    %24 = vector.broadcast %23 : vector<1x128xf32> to vector<8x128xf32>
    %25 = arith.addf %22, %24 : vector<8x128xf32>
    %c0_22 = arith.constant 0 : index
    %c0_23 = arith.constant 0 : index
    %26 = vector.load %arg10[%c0_22, %c0_23] : memref<8x128xf32, #tpu.memory_space<vmem>>, vector<8x128xf32>
    tpu.vector_store %arg10[%c0_22, %c0_23], %25 {strides = array<i32>} : memref<8x128xf32, #tpu.memory_space<vmem>>, vector<8x128xf32>,
    return
  }
  func.func @transform_0(%arg0: i32) -> (i32, i32) {
    %c0_i32 = arith.constant 0 : i32
    %c0_i32_0 = arith.constant 0 : i32
    return %arg0, %c0_i32 : i32, i32
  }
  func.func @transform_1(%arg0: i32) -> (i32, i32) {
    %c0_i32 = arith.constant 0 : i32
    %c0_i32_0 = arith.constant 0 : i32
    return %arg0, %c0_i32 : i32, i32
  }
  func.func @transform_2(%arg0: i32) -> (i32, i32) {
    %c0_i32 = arith.constant 0 : i32
    %c0_i32_0 = arith.constant 0 : i32
    %c0_i32_1 = arith.constant 0 : i32
    return %c0_i32, %c0_i32_0 : i32, i32
  }
  func.func @transform_3(%arg0: i32) -> (i32, i32) {
    %c0_i32 = arith.constant 0 : i32
    %c0_i32_0 = arith.constant 0 : i32
    %c0_i32_1 = arith.constant 0 : i32
    return %c0_i32, %c0_i32_0 : i32, i32
  }
  func.func @transform_4(%arg0: i32) -> (i32, i32) {
    %c0_i32 = arith.constant 0 : i32
    %c0_i32_0 = arith.constant 0 : i32
    %c0_i32_1 = arith.constant 0 : i32
    return %c0_i32, %c0_i32_0 : i32, i32
  }
  func.func @transform_5(%arg0: i32) -> (i32, i32) {
    %c0_i32 = arith.constant 0 : i32
    %c0_i32_0 = arith.constant 0 : i32
    %c0_i32_1 = arith.constant 0 : i32
    return %c0_i32, %c0_i32_0 : i32, i32
  }
  func.func @transform_6(%arg0: i32) -> (i32, i32) {
    %c0_i32 = arith.constant 0 : i32
    %c0_i32_0 = arith.constant 0 : i32
    %c0_i32_1 = arith.constant 0 : i32
    return %c0_i32, %c0_i32_0 : i32, i32
  }
  func.func @transform_7(%arg0: i32) -> (i32, i32) {
    %c0_i32 = arith.constant 0 : i32
    %c0_i32_0 = arith.constant 0 : i32
    %c0_i32_1 = arith.constant 0 : i32
    return %c0_i32, %c0_i32_0 : i32, i32
  }
  func.func @transform_8(%arg0: i32) -> (i32, i32) {
    %c0_i32 = arith.constant 0 : i32
    %c0_i32_0 = arith.constant 0 : i32
    %c0_i32_1 = arith.constant 0 : i32
    return %c0_i32, %c0_i32_0 : i32, i32
  }
  func.func @transform_9(%arg0: i32) -> (i32, i32) {
    %c0_i32 = arith.constant 0 : i32
    %c0_i32_0 = arith.constant 0 : i32
    return %arg0, %c0_i32 : i32, i32
  }
}

</mosaic_0001>

<bundles_post_ra>
// kernel: soft_q_forward.1
= control target key start
LH: loop header
LB: loop body
LE: loop exit
PB: predicated region body
PF: predicated region fallthrough
CT: control target
= control target key end

     0   :  { %14 = vsyncpa [#allocation3], 0  ;;  %s948_s0 = inlined_call_operand.vmem [shape: bf16[8,16], index: 0, kind: input, shape index: {}]   ;;  %s949_s1 = inlined_call_operand.vmem [shape: bf16[8,8], index: 1, kind: input, shape index: {}]   ;;  %s950_s2 = inlined_call_operand.vmem [shape: bf16[16,256], index: 2, kind: input, shape index: {}]   ;;  %s951_s3 = inlined_call_operand.vmem [shape: bf16[8,256], index: 3, kind: input, shape index: {}]   ;;  %s952_s4 = inlined_call_operand.vmem [shape: f32[1,256], index: 4, kind: input, shape index: {}]   ;;  %s953_s5 = inlined_call_operand.hbm [shape: bf16[256,256], index: 5, kind: input, shape index: {}]   ;;  %s954_s6 = inlined_call_operand.vmem [shape: f32[1,256], index: 6, kind: input, shape index: {}]   ;;  %s955_s7 = inlined_call_operand.hbm [shape: bf16[256,128], index: 7, kind: input, shape index: {}]   ;;  %s956_s8 = inlined_call_operand.hbm [shape: f32[1,128], index: 8, kind: input, shape index: {}]   ;;  %s957_s9 = inlined_call_operand.vmem [shape: f32[8,128], index: 9, kind: output, shape index: {}]  }
   0x1   :  { %15 = vsyncpa [#allocation5], 0  ;;  %s857_s30 = smov [#allocation4]  }
   0x2   :  { %s45_s10 = sshll.u32 %s857_s30, 4  ;;  %s46_s10 = int_to_ptr.vmem [resolvable:$true] %s45_s10 }
   0x3   :  { %s801_s11 = scalar_lea.vmem %s46_s10, 2048  ;;  %p806_p1 = scmp.lt.s32.totalorder %s46_s10, %s46_s10 }
   0x4   :  { %p802_p0 = scmp.ne.s32.totalorder %s46_s10, %s801_s11  ;;  %p807_p2 = scmp.lt.s32.totalorder %s801_s11, %s801_s11 }
   0x6   :  { %p808_p3 = por %p807_p2, %p806_p1 }
   0x8   :  { %p809_p4 = pnand %p808_p3, %p802_p0 }
   0xa   :  { %812 = shalt.err (!%p809_p4)
}
   0xb   :  { %s858_s12 = smov 64   ;;  %s859_s13 = smov 4  }
   0xc   :  { %51 = dma.hbm_to_vmem [thread:$0]  %s955_s7, 2048, %s46_s10, [#allocation5], %s858_s12, %s858_s12, %s859_s13  }
   0xd   :  { %s860_s16 = smov [#allocation2]  }
   0xe   :  { %s31_s17 = sshll.u32 %s860_s16, 4  ;;  %s32_s17 = int_to_ptr.vmem [resolvable:$true] %s31_s17 }
   0xf   :  { %s821_s18 = scalar_lea.vmem %s32_s17, 4096  ;;  %p826_p6 = scmp.lt.s32.totalorder %s32_s17, %s32_s17 }
  0x10   :  { %p822_p5 = scmp.ne.s32.totalorder %s32_s17, %s821_s18  ;;  %p827_p7 = scmp.lt.s32.totalorder %s821_s18, %s821_s18 }
  0x12   :  { %p828_p8 = por %p827_p7, %p826_p6 }
  0x14   :  { %p829_p9 = pnand %p828_p8, %p822_p5 }
  0x16   :  { %832 = shalt.err (!%p829_p9)
}
  0x17   :  { %s861_s19 = smov 128   ;;  %s862_s20 = smov 8  }
  0x18   :  { %37 = dma.hbm_to_vmem [thread:$0]  %s953_s5, 4096, %s32_s17, [#allocation3], %s861_s19, %s861_s19, %s862_s20  }
  0x19   :  { %s863_s23 = smov [#allocation6]  }
  0x1a   :  { %s58_s24 = sshll.u32 %s863_s23, 4  ;;  %s59_s24 = int_to_ptr.vmem [resolvable:$true] %s58_s24 }
  0x1b   :  { %s841_s7 = scalar_lea.vmem %s59_s24, 16  ;;  %s845_s25 = scalar_lea.vmem %s59_s24, 32 }
  0x1c   :  { %p842_p10 = scmp.ne.s32.totalorder %s59_s24, %s841_s7  ;;  %p846_p11 = scmp.lt.s32.totalorder %s59_s24, %s59_s24 }
  0x1d   :  { %p847_p12 = scmp.lt.s32.totalorder %s845_s25, %s841_s7 }
  0x1f   :  { %p848_p13 = por %p847_p12, %p846_p11 }
  0x21   :  { %p849_p0 = pnand %p848_p13, %p842_p10 }
  0x23   :  { %852 = shalt.err (!%p849_p0)
}
  0x24   :  { %61 = dma.hbm_to_vmem [thread:$0]  %s956_s8, 16, %s59_s24, [#allocation5]  }
  0x25   :  { %853 = dma.done.wait [#allocation3], 4096  }
  0x26   :  { %854 = vsyncadd [#allocation3], 4294963200 }
  0x27   :  { %855 = dma.done.wait [#allocation5], 2064  }
  0x28   :  { %856 = vsyncadd [#allocation5], 4294965232  ;;  %v864_v0 = vmov 0   ;;  %v76_v1 = vld [vmem:[%s951_s3] sm:$0xff]  ;;  %vm86_vm0 = vcmask 1043456   ;;  %vm82_vm1 = vcmask 64512   ;;  %v191_v53 = vlaneseq }
  0x29   :  { %125 = vmatprep.mubr.bf16.mxu1 %v864_v0  ;;  %v639_v2 = vcombine.high %v76_v1, %v76_v1  ;;  %v638_v3 = vcombine.low %v76_v1, %v76_v1  ;;  %v728_v4 = vld [vmem:[%s950_s2 + $0x4] ss:$8 sps:$4 sm:$0xff]   ;;  %v75_v5 = vld [vmem:[%s949_s1] sm:$0xf]  ;;  %v729_v7 = vld [vmem:[#allocation2 + $0x74] ss:$8 sps:$4 sm:$0xff]  }
  0x2a   :  { %v731_v8 = vld [vmem:[#allocation2 + $0x70] ss:$8 sps:$4 sm:$0xff]   ;;  %v726_v9 = vld [vmem:[%s950_s2] ss:$8 sps:$4 sm:$0xff]   ;;  %v732_v10 = vld [vmem:[#allocation2 + $0x64] ss:$8 sps:$4 sm:$0xff]   ;;  %411 = vmatprep.subr.bf16.mxu0 %v729_v7 }
  0x2b   :  { %640 = vmatprep.subr.msk.bf16.mxu1 %vm86_vm0, %v639_v2  ;;  %v88_v6 = vsel %vm86_vm0, %v638_v3, 0  ;;  %412 = vmatpush1.bf16.msra.mxu0 %v731_v8  ;;  %v734_v11 = vld [vmem:[#allocation2 + $0x60] ss:$8 sps:$4 sm:$0xff]   ;;  %v735_v12 = vld [vmem:[#allocation2 + $0x54] ss:$8 sps:$4 sm:$0xff]   ;;  %vm144_vm2 = vcmask 130048  }
  0x2c   :  { %108 = vmatpush1.bf16.msra.mxu1 %v88_v6  ;;  %413 = vmatprep.subr.bf16.mxu0 %v732_v10  ;;  %v737_v13 = vld [vmem:[#allocation2 + $0x50] ss:$8 sps:$4 sm:$0xff]   ;;  %v738_v14 = vld [vmem:[#allocation2 + $0x44] ss:$8 sps:$4 sm:$0xff]   ;;  %v72_v15 = vld [vmem:[%s948_s0] sm:$0xf] }
  0x2d   :  { %162 = vmatprep.subr.bf16.mxu1 %v728_v4  ;;  %v740_v16 = vld [vmem:[#allocation2 + $0x40] ss:$8 sps:$4 sm:$0xff]   ;;  %v741_v17 = vld [vmem:[#allocation2 + $0x34] ss:$8 sps:$4 sm:$0xff]   ;;  %v743_v18 = vld [vmem:[#allocation2 + $0x30] ss:$8 sps:$4 sm:$0xff]  }
  0x2e   :  { %v744_v19 = vld [vmem:[#allocation2 + $0x24] ss:$8 sps:$4 sm:$0xff]   ;;  %v746_v20 = vld [vmem:[#allocation2 + $0x20] ss:$8 sps:$4 sm:$0xff]   ;;  %v747_v21 = vld [vmem:[#allocation2 + $0x14] ss:$8 sps:$4 sm:$0xff]  }
  0x2f   :  { %641 = vmatmul.mubr.msk.bf16.vlgmr.msra.gmra.mxu1 %vm82_vm1, %v75_v5  ;;  %414 = vmatpush1.bf16.msra.mxu0 %v734_v11  ;;  %v749_v22 = vld [vmem:[#allocation2 + $0x10] ss:$8 sps:$4 sm:$0xff]   ;;  %v750_v23 = vld [vmem:[#allocation2 + $0x4] ss:$8 sps:$4 sm:$0xff]   ;;  %v752_v24 = vld [vmem:[#allocation2] ss:$8 sps:$4 sm:$0xff]  }
  0x30   :  { %163 = vmatpush1.bf16.msra.mxu1 %v726_v9  ;;  %180 = vmatprep.mubr.bf16.mxu1 %v864_v0  ;;  %v753_v25 = vld [vmem:[#allocation2 + $0xf4] ss:$8 sps:$4 sm:$0xff]   ;;  %v755_v26 = vld [vmem:[#allocation2 + $0xf0] ss:$8 sps:$4 sm:$0xff]   ;;  %v756_v27 = vld [vmem:[#allocation2 + $0xe4] ss:$8 sps:$4 sm:$0xff]  }
  0x31   :  { %415 = vmatprep.subr.bf16.mxu0 %v735_v12  ;;  %v758_v28 = vld [vmem:[#allocation2 + $0xe0] ss:$8 sps:$4 sm:$0xff]   ;;  %v759_v29 = vld [vmem:[#allocation2 + $0xd4] ss:$8 sps:$4 sm:$0xff]   ;;  %v761_v30 = vld [vmem:[#allocation2 + $0xd0] ss:$8 sps:$4 sm:$0xff]  }
  0x32   :  { %v762_v31 = vld [vmem:[#allocation2 + $0xc4] ss:$8 sps:$4 sm:$0xff]   ;;  %v764_v32 = vld [vmem:[#allocation2 + $0xc0] ss:$8 sps:$4 sm:$0xff]   ;;  %v765_v33 = vld [vmem:[#allocation2 + $0xb4] ss:$8 sps:$4 sm:$0xff]  }
  0x33   :  { %416 = vmatpush1.bf16.msra.mxu0 %v737_v13  ;;  %v767_v34 = vld [vmem:[#allocation2 + $0xb0] ss:$8 sps:$4 sm:$0xff]   ;;  %v768_v35 = vld [vmem:[#allocation2 + $0xa4] ss:$8 sps:$4 sm:$0xff]   ;;  %v770_v36 = vld [vmem:[#allocation2 + $0xa0] ss:$8 sps:$4 sm:$0xff]  }
  0x34   :  { %417 = vmatprep.subr.bf16.mxu0 %v738_v14  ;;  %v771_v37 = vld [vmem:[#allocation2 + $0x94] ss:$8 sps:$4 sm:$0xff]   ;;  %v773_v38 = vld [vmem:[#allocation2 + $0x90] ss:$8 sps:$4 sm:$0xff]   ;;  %v774_v39 = vld [vmem:[#allocation2 + $0x84] ss:$8 sps:$4 sm:$0xff]  }
  0x35   :  { %v776_v40 = vld [vmem:[#allocation2 + $0x80] ss:$8 sps:$4 sm:$0xff]   ;;  %v777_v41 = vld [vmem:[#allocation4 + $0x78] sm:$0xff]   ;;  %v779_v43 = vld [vmem:[#allocation4 + $0x70] sm:$0xff]   ;;  %v192_v54 = vshrl.u32 %v191_v53, 7 }
  0x36   :  { %v778_v42 = vld [vmem:[#allocation4 + $0x38] sm:$0xff]   ;;  %694 = vmatprep.subr.bf16.mxu1 %v777_v41  ;;  %v780_v44 = vld [vmem:[#allocation4 + $0x30] sm:$0xff]   ;;  %v781_v45 = vld [vmem:[#allocation4 + $0x68] sm:$0xff]  }
  0x37   :  { %644 = vmatmul.mubr.msk.bf16.vlgmr.msra.gmra.mxu1 %vm144_vm2, %v72_v15  ;;  %418 = vmatpush1.bf16.msra.mxu0 %v740_v16  ;;  %v782_v46 = vld [vmem:[#allocation4 + $0x28] sm:$0xff]   ;;  %v783_v47 = vld [vmem:[#allocation4 + $0x60] sm:$0xff]   ;;  %v785_v49 = vld [vmem:[#allocation4 + $0x58] sm:$0xff]   ;;  %v193_v57 = vsub.s32 0, %v192_v54  ;;  %v197_v60 = vsub.s32 1, %v192_v54 }
  0x38   :  { %419 = vmatprep.subr.bf16.mxu0 %v741_v17  ;;  %695 = vmatpush3.bf16.msra.mxu1 %v778_v42  ;;  %v784_v48 = vld [vmem:[#allocation4 + $0x20] sm:$0xff]   ;;  %v786_v50 = vld [vmem:[#allocation4 + $0x18] sm:$0xff]   ;;  %v787_v51 = vld [vmem:[#allocation4 + $0x50] sm:$0xff]  }
  0x39   :  { %696 = vmatprep.subr.bf16.mxu1 %v779_v43  ;;  %v788_v52 = vld [vmem:[#allocation4 + $0x10] sm:$0xff]   ;;  %v189_v59 = vld [vmem:[%s952_s4] sm:$0x3]  ;;  %v789_v12 = vld [vmem:[#allocation4 + $0x48] sm:$0xff]  }
  0x3a   :  { %v194_v62 = vrot.slane %v189_v59, %v193_v57  ;;  %v198_v1 = vrot.slane %v189_v59, %v197_v60  ;;  %v790_v13 = vld [vmem:[#allocation4 + $0x8] sm:$0xff]   ;;  %v791_v14 = vld [vmem:[#allocation4 + $0x40] sm:$0xff]  }
  0x3b   :  { %420 = vmatpush1.bf16.msra.mxu0 %v743_v18  ;;  %v792_v15 = vld [vmem:[#allocation4] sm:$0xff]  }
  0x3c   :  { %421 = vmatprep.subr.bf16.mxu0 %v744_v19  ;;  %697 = vmatpush3.bf16.msra.mxu1 %v780_v44  ;;  %v239_v16 = vld [vmem:[%s954_s6] sm:$0x3] }
  0x3d   :  { %698 = vmatprep.subr.bf16.mxu1 %v781_v45  ;;  %v244_v17 = vrot.slane %v239_v16, %v193_v57  ;;  %v248_v18 = vrot.slane %v239_v16, %v197_v60 }
  0x3f   :  { %422 = vmatpush1.bf16.msra.mxu0 %v746_v20 }
  0x40   :  { %423 = vmatprep.subr.bf16.mxu0 %v747_v21  ;;  %699 = vmatpush3.bf16.msra.mxu1 %v782_v46 }
  0x41   :  { %700 = vmatprep.subr.bf16.mxu1 %v783_v47 }
  0x43   :  { %424 = vmatpush1.bf16.msra.mxu0 %v749_v22 }
  0x44   :  { %425 = vmatprep.subr.bf16.mxu0 %v750_v23  ;;  %701 = vmatpush3.bf16.msra.mxu1 %v784_v48 }
  0x45   :  { %702 = vmatprep.subr.bf16.mxu1 %v785_v49 }
  0x47   :  { %426 = vmatpush1.bf16.msra.mxu0 %v752_v24 }
  0x48   :  { %427 = vmatprep.subr.bf16.mxu0 %v753_v25  ;;  %703 = vmatpush3.bf16.msra.mxu1 %v786_v50 }
  0x49   :  { %704 = vmatprep.subr.bf16.mxu1 %v787_v51 }
  0x4b   :  { %428 = vmatpush2.bf16.msra.mxu0 %v755_v26 }
  0x4c   :  { %429 = vmatprep.subr.bf16.mxu0 %v756_v27  ;;  %705 = vmatpush3.bf16.msra.mxu1 %v788_v52 }
  0x4d   :  { %706 = vmatprep.subr.bf16.mxu1 %v789_v12 }
  0x4f   :  { %430 = vmatpush2.bf16.msra.mxu0 %v758_v28 }
  0x50   :  { %431 = vmatprep.subr.bf16.mxu0 %v759_v29  ;;  %707 = vmatpush3.bf16.msra.mxu1 %v790_v13 }
  0x51   :  { %708 = vmatprep.subr.bf16.mxu1 %v791_v14 }
  0x53   :  { %432 = vmatpush2.bf16.msra.mxu0 %v761_v30  ;;  %v677_v30 = vld [vmem:[#allocation6] ss:$0 sm:$0xff] }
  0x54   :  { %433 = vmatprep.subr.bf16.mxu0 %v762_v31  ;;  %709 = vmatpush3.bf16.msra.mxu1 %v792_v15 }
  0x57   :  { %434 = vmatpush2.bf16.msra.mxu0 %v764_v32 }
  0x58   :  { %435 = vmatprep.subr.bf16.mxu0 %v765_v33 }
  0x5b   :  { %436 = vmatpush2.bf16.msra.mxu0 %v767_v34 }
  0x5c   :  { %437 = vmatprep.subr.bf16.mxu0 %v768_v35 }
  0x5f   :  { %438 = vmatpush2.bf16.msra.mxu0 %v770_v36 }
  0x60   :  { %439 = vmatprep.subr.bf16.mxu0 %v771_v37 }
  0x63   :  { %440 = vmatpush2.bf16.msra.mxu0 %v773_v38 }
  0x64   :  { %441 = vmatprep.subr.bf16.mxu0 %v774_v39 }
  0x67   :  { %442 = vmatpush2.bf16.msra.mxu0 %v776_v40 }
  0xef   :  { %v127_v55 = vpop.f32.mrf.mxu1 }
  0xf1   :  { %v129_v56 = vpop.f32.mrf.mxu1 }
  0xf3   :  { %v131_v58 = vpop.f32.mrf.mxu1 }
  0xf5   :  { %v132_v61 = vpop.f32.mrf.mxu1 }
  0xf7   :  { %v182_v63 = vpop.f32.mrf.mxu1 }
  0xf8   :  { %v183_v0 = vadd.f32 %v182_v63, %v127_v55 }
  0xf9   :  { %v184_v2 = vpop.f32.mrf.mxu1 }
  0xfa   :  { %v201_v3 = vadd.f32 %v194_v62, %v183_v0  ;;  %v185_v4 = vadd.f32 %v184_v2, %v129_v56 }
  0xfb   :  { %v186_v5 = vpop.f32.mrf.mxu1 }
  0xfc   :  { %v202_v6 = vadd.f32 %v198_v1, %v185_v4  ;;  %v203_v7 = vmax.f32 %v201_v3, 0.0 }
  0xfd   :  { %v187_v8 = vpop.f32.mrf.mxu1 }
  0xfe   :  { %v204_v9 = vmax.f32 %v202_v6, 0.0  ;;  %v205_v11 = vpack.c.bf16 %v203_v7, %v203_v7 }
 0x100   :  { %v206_v10 = vpack.c.bf16 %v204_v9, %v204_v9 }
 0x102   :  { %443 = vmatprep.mubr.bf16.mxu0 %v206_v10 }
 0x103   :  { %444 = vmatmul.mubr.bf16.vlgmr.msra.gmra.mxu0 %v205_v11 }
 0x1c3   :  { %v445_v19 = vpop.f32.mrf.mxu0 }
 0x1c4   :  { %v446_v20 = vadd.f32 %v445_v19, %v244_v17 }
 0x1c5   :  { %v447_v21 = vpop.f32.mrf.mxu0 }
 0x1c6   :  { %v448_v22 = vadd.f32 %v447_v21, %v248_v18  ;;  %v452_v23 = vmax.f32 %v446_v20, 0.0 }
 0x1c7   :  { %v449_v24 = vpop.f32.mrf.mxu0 }
 0x1c8   :  { %v453_v25 = vmax.f32 %v448_v22, 0.0  ;;  %v454_v28 = vpack.c.bf16 %v452_v23, %v452_v23 }
 0x1c9   :  { %v450_v26 = vpop.f32.mrf.mxu0 }
 0x1ca   :  { %v455_v27 = vpack.c.bf16 %v453_v25, %v453_v25 }
 0x1cc   :  { %623 = vmatprep.mubr.bf16.mxu1 %v455_v27 }
 0x1cd   :  { %624 = vmatmul.mubr.bf16.vlgmr.msra.gmra.mxu1 %v454_v28 }
 0x28d   :  { %v710_v29 = vpop.f32.mrf.mxu1 }
 0x28f   :  { %v711_v31 = vpop.f32.mrf.mxu1 }
 0x290   :  { %v712_v32 = vadd.f32 %v711_v31, %v710_v29 }
 0x291   :  { %v713_v33 = vpop.f32.mrf.mxu1 }
 0x292   :  { %v626_v34 = vadd.f32 %v712_v32, %v677_v30 }
 0x293   :  { %v714_v35 = vpop.f32.mrf.mxu1 }
 0x294   :  { %631 = vst [vmem:[%s957_s9] sm:$0xff] %v626_v34 }
 0x295   :  { %636 = vsyncpa [#allocation3], 1 }
 0x296   :  { %637 = vsyncpa [#allocation5], 1 }

</bundles_post_ra>
